<compile_context>
chip_gen: v7x
topology: tpu7x:2x2x1
jax: 0.10.0
libtpu: 0.0.40
codegen_flags: <defaults>
</compile_context>

<pallas_src>
import jax
import jax.numpy as jnp
from jax.experimental import pallas as pl
from jax.experimental.pallas import tpu as pltpu


def _actnorm_kernel(x_ref, loc_ref, scale_ref, o_ref):
    # x_ref:               (row_blk, lane_blk) tile of the 2-D view of x.
    # loc_ref / scale_ref: (row_blk, 1) or (1, lane_blk) float32; jnp
    #                      broadcasting covers both layouts.
    x = x_ref[...].astype(jnp.float32)
    o_ref[...] = (scale_ref[...] * (x + loc_ref[...])).astype(o_ref.dtype)


def _vmem_budget():
    """Generation-aware (per_block_budget_bytes, vmem_limit_bytes)."""
    try:
        cap = int(getattr(pltpu.get_tpu_info(), "vmem_capacity_bytes", 64 << 20))
    except Exception:
        cap = 64 << 20
    # Explicit scoped-VMEM limit with headroom under the physical capacity
    # (v5e/v6e: 128 MiB physical, v7x: 64 MiB physical).  The default scoped
    # limits (16/32/32 MiB) are too small for roofline-sized blocks on v5e.
    vmem_limit = min((cap * 3) // 4, 96 << 20)
    # ~4 live blocks (double-buffered input + output) + params + headroom.
    budget = max(1 << 20, min(vmem_limit // 6, 8 << 20))
    return budget, vmem_limit


def _sublane(itemsize):
    return {4: 8, 2: 16, 1: 32}.get(itemsize, 8)


def _choose_blocks(R, L, itemsize, budget):
    """(row_block, lane_block) for an HBM-bound elementwise op on an (R, L) view."""
    sub = _sublane(itemsize)

    # Lane (last-dim) block: lane-dense, unmasked whenever possible.
    if L <= 128:
        lane_blk = L                                    # full extent (legal)
    elif L % 128 == 0:
        max_lanes = max(128, (budget // (sub * itemsize)) // 128 * 128)
        lane_blk = min(L, max_lanes)
    else:
        # Ragged last dim: take the whole extent if it fits the budget (one
        # unragged full-width block per row block), else a 128-multiple with a
        # masked edge block.
        if L * sub * itemsize <= budget:
            lane_blk = L
        else:
            max_lanes = max(128, (budget // (sub * itemsize)) // 128 * 128)
            lane_blk = min((L // 128) * 128, max_lanes)

    # Row block: multiple of the sublane granularity, or the full extent.
    if R <= sub:
        row_blk = R
    else:
        max_rows = max(sub, (budget // (lane_blk * itemsize)) // sub * sub)
        row_blk = min((R // sub) * sub, max_rows)
    return row_blk, lane_blk, sub


def _ensure_min_grid_steps(R, L, row_blk, lane_blk, sub, min_steps=4):
    """Shrink blocks (keeping alignment) so the grid has work for 2 TCs (v7x)."""
    def nsteps(rb, lb):
        return pl.cdiv(R, rb) * pl.cdiv(L, lb)

    for _ in range(16):
        if nsteps(row_blk, lane_blk) >= min_steps:
            break
        if row_blk >= 2 * sub and row_blk % sub == 0:
            row_blk = max(sub, (row_blk // 2) // sub * sub)
        elif lane_blk >= 256 and lane_blk % 128 == 0:
            lane_blk = max(128, (lane_blk // 2) // 128 * 128)
        else:
            break
    return row_blk, lane_blk


def actnorm_forward(x, loc, scale, logdet=False):
    """ActNorm forward. x is NCHW or (B, C) (squeezed, like PyTorch)."""
    squeeze = x.ndim == 2
    if squeeze:
        B, C = x.shape
        H = W = 1
    else:
        B, C, H, W = x.shape

    loc_c = loc.reshape(C).astype(jnp.float32)
    scale_c = scale.reshape(C).astype(jnp.float32)

    HW = H * W
    budget, vmem_limit = _vmem_budget()

    # Layout choice (both are free, layout-preserving reshapes of NCHW):
    #  * row-view  (B*C, H*W)  when H*W is large and 128-aligned
    #  * lane-view (B, C*H*W)  otherwise (incl. the squeezed (B, C) input) --
    #    keeps the lane axis wide so stores are full-width.
    use_row_view = (not squeeze) and HW >= 128 and HW % 128 == 0

    if use_row_view:
        R, L = B * C, HW
        x2 = x.reshape(R, L)
        # One param value per row (row b*C + c -> channel c); tiny B*C op.
        loc_v = jnp.broadcast_to(loc_c[None, :], (B, C)).reshape(R, 1)
        scale_v = jnp.broadcast_to(scale_c[None, :], (B, C)).reshape(R, 1)
    else:
        R, L = B, C * HW
        x2 = x.reshape(R, L)
        # One param value per lane (lane c*H*W + hw -> channel c).
        loc_v = jnp.broadcast_to(loc_c[:, None], (C, HW)).reshape(1, L)
        scale_v = jnp.broadcast_to(scale_c[:, None], (C, HW)).reshape(1, L)

    row_blk, lane_blk, sub = _choose_blocks(R, L, x.dtype.itemsize, budget)
    row_blk, lane_blk = _ensure_min_grid_steps(R, L, row_blk, lane_blk, sub)
    grid = (pl.cdiv(R, row_blk), pl.cdiv(L, lane_blk))

    if use_row_view:
        param_spec = pl.BlockSpec((row_blk, 1), lambda i, j: (i, 0))
    else:
        param_spec = pl.BlockSpec((1, lane_blk), lambda i, j: (0, j))

    out2 = pl.pallas_call(
        _actnorm_kernel,
        out_shape=jax.ShapeDtypeStruct((R, L), x.dtype),
        grid_spec=pltpu.PrefetchScalarGridSpec(
            num_scalar_prefetch=0,
            grid=grid,
            in_specs=[
                pl.BlockSpec((row_blk, lane_blk), lambda i, j: (i, j)),  # x tile
                param_spec,                                              # loc
                param_spec,                                              # scale
            ],
            out_specs=pl.BlockSpec((row_blk, lane_blk), lambda i, j: (i, j)),
        ),
        compiler_params=pltpu.CompilerParams(
            dimension_semantics=("parallel", "parallel"),
            vmem_limit_bytes=vmem_limit),
    )(x2, loc_v, scale_v)

    h = out2.reshape(B, C) if squeeze else out2.reshape(B, C, H, W)

    if logdet:
        # Param-only reduction over C (tiny) -> plain-JAX glue, kept in f32.
        log_abs = jnp.log(jnp.abs(scale_c))
        ld = (H * W) * jnp.sum(log_abs) * jnp.ones((B,), dtype=jnp.float32)
        return h, ld
    return h


# TODO(synk): the data-dependent first-call initialize() (running mean/std,
# `initialized` buffer mutation), training-mode branch and reverse() are
# stateful module logic rather than a kernel hot path; only the
# already-initialized forward is implemented here.

if __name__ == "__main__":
    key = jax.random.PRNGKey(0)
    B, C, H, W = 2, 4, 16, 16

    kx, kl, ks, k2 = jax.random.split(key, 4)
    x = jax.random.normal(kx, (B, C, H, W), dtype=jnp.float32)

    # Parameters: __init__ gives loc = zeros(1,C,1,1), scale = ones(1,C,1,1).
    # Perturb them deterministically so broadcasting is actually exercised.
    loc = jnp.zeros((1, C, 1, 1), jnp.float32) + 0.1 * jax.random.normal(kl, (1, C, 1, 1))
    scale = jnp.ones((1, C, 1, 1), jnp.float32) + 0.1 * jax.random.normal(ks, (1, C, 1, 1))

    fwd = jax.jit(actnorm_forward, static_argnames=("logdet",))

    # --- 4-D NCHW path (row-view layout) ---
    h, ld = fwd(x, loc, scale, logdet=True)
    h = jax.block_until_ready(h)
    ld = jax.block_until_ready(ld)

    h_ref = scale * (x + loc)
    ld_ref = H * W * jnp.sum(jnp.log(jnp.abs(scale))) * jnp.ones((B,), jnp.float32)

    assert h.shape == (B, C, H, W)
    assert jnp.allclose(h, h_ref, atol=1e-5, rtol=1e-5)
    assert jnp.allclose(ld, ld_ref, atol=1e-5, rtol=1e-5)

    # --- squeezed 2-D (B, C) path (lane-view layout) ---
    B2, C2 = 4, 32
    x2d = jax.random.normal(k2, (B2, C2), dtype=jnp.float32)
    loc2 = jnp.zeros((1, C2, 1, 1), jnp.float32) + 0.05
    scale2 = jnp.ones((1, C2, 1, 1), jnp.float32) * 1.25
    h2 = jax.block_until_ready(fwd(x2d, loc2, scale2, logdet=False))
    h2_ref = (scale2 * (x2d[:, :, None, None] + loc2))[:, :, 0, 0]
    assert h2.shape == (B2, C2)
    assert jnp.allclose(h2, h2_ref, atol=1e-5, rtol=1e-5)

    print("KERNEL_OK")
</pallas_src>

<mosaic_0001>
module attributes {stable_mosaic.version = 11 : i64} {
  func.func @_actnorm_kernel(%arg0: i32, %arg1: i32, %arg2: memref<8x128xf32, #tpu.memory_space<vmem>>, %arg3: memref<8x1xf32, #tpu.memory_space<vmem>>, %arg4: memref<8x1xf32, #tpu.memory_space<vmem>>, %arg5: memref<8x128xf32, #tpu.memory_space<vmem>>) attributes {dimension_semantics = [#tpu.dimension_semantics<parallel>, #tpu.dimension_semantics<parallel>], iteration_bounds = array<i64: 1, 2>, scalar_prefetch = 0 : i64, scratch_operands = 0 : i64, tpu.core_type = #tpu.core_type<tc>, window_params = [{transform_indices = @transform_0, window_bounds = array<i64: 8, 128>}, {transform_indices = @transform_1, window_bounds = array<i64: 8, 1>}, {transform_indices = @transform_2, window_bounds = array<i64: 8, 1>}, {transform_indices = @transform_3, window_bounds = array<i64: 8, 128>}]} {
    %c0 = arith.constant 0 : index
    %c0_0 = arith.constant 0 : index
    %0 = vector.load %arg2[%c0, %c0_0] : memref<8x128xf32, #tpu.memory_space<vmem>>, vector<8x128xf32>
    %c0_1 = arith.constant 0 : index
    %c0_2 = arith.constant 0 : index
    %1 = vector.load %arg4[%c0_1, %c0_2] : memref<8x1xf32, #tpu.memory_space<vmem>>, vector<8x1xf32>
    %c0_3 = arith.constant 0 : index
    %c0_4 = arith.constant 0 : index
    %2 = vector.load %arg3[%c0_3, %c0_4] : memref<8x1xf32, #tpu.memory_space<vmem>>, vector<8x1xf32>
    %3 = vector.broadcast %2 : vector<8x1xf32> to vector<8x128xf32>
    %4 = arith.addf %0, %3 : vector<8x128xf32>
    %5 = vector.broadcast %1 : vector<8x1xf32> to vector<8x128xf32>
    %6 = arith.mulf %5, %4 : vector<8x128xf32>
    %c0_5 = arith.constant 0 : index
    %c0_6 = arith.constant 0 : index
    %7 = vector.load %arg5[%c0_5, %c0_6] : memref<8x128xf32, #tpu.memory_space<vmem>>, vector<8x128xf32>
    tpu.vector_store %arg5[%c0_5, %c0_6], %6 {strides = array<i32>} : memref<8x128xf32, #tpu.memory_space<vmem>>, vector<8x128xf32>,
    return
  }
  func.func @transform_0(%arg0: i32, %arg1: i32) -> (i32, i32) {
    %c0_i32 = arith.constant 0 : i32
    return %arg0, %arg1 : i32, i32
  }
  func.func @transform_1(%arg0: i32, %arg1: i32) -> (i32, i32) {
    %c0_i32 = arith.constant 0 : i32
    %c0_i32_0 = arith.constant 0 : i32
    return %arg0, %c0_i32 : i32, i32
  }
  func.func @transform_2(%arg0: i32, %arg1: i32) -> (i32, i32) {
    %c0_i32 = arith.constant 0 : i32
    %c0_i32_0 = arith.constant 0 : i32
    return %arg0, %c0_i32 : i32, i32
  }
  func.func @transform_3(%arg0: i32, %arg1: i32) -> (i32, i32) {
    %c0_i32 = arith.constant 0 : i32
    return %arg0, %arg1 : i32, i32
  }
}

</mosaic_0001>

<bundles_post_ra>
// kernel: mul.3
= control target key start
LH: loop header
LB: loop body
LE: loop exit
PB: predicated region body
PF: predicated region fallthrough
CT: control target
= control target key end

     0   :  { %s66_s0 = inlined_call_operand.<no memory space> [shape: f32[], index: 0, kind: input, shape index: {}]   ;;  %s67_s1 = inlined_call_operand.hbm [shape: f32[2], index: 1, kind: output, shape index: {}]  }
   0x1   :  { %v2_v0 = vstv %s66_s0 }
   0x2   :  { %3 = vsyncpa [#allocation1], 0  ;;  %4 = vst [vmem:[#allocation0] sm:$0x1] %v2_v0  ;;  %s40_s0 = smov [#allocation0]  }
   0x3   :  { %s9_s8 = sshll.u32 %s40_s0, 4  ;;  %s10_s8 = int_to_ptr.vmem [resolvable:$true] %s9_s8 }
   0x4   :  { %s16_s9 = scalar_lea.vmem %s10_s8, 16  ;;  %s20_s10 = scalar_lea.vmem %s10_s8, 32 }
   0x5   :  { %p17_p0 = scmp.ne.s32.totalorder %s10_s8, %s16_s9  ;;  %p21_p1 = scmp.lt.s32.totalorder %s10_s8, %s10_s8 }
   0x6   :  { %p22_p2 = scmp.lt.s32.totalorder %s20_s10, %s16_s9 }
   0x8   :  { %p23_p3 = por %p22_p2, %p21_p1 }
   0xa   :  { %p24_p4 = pnand %p23_p3, %p17_p0 }
   0xc   :  { %27 = shalt.err (!%p24_p4)
}
   0xd   :  { %s28_s13 = scalar_lea.hbm %s67_s1, 16 }
   0xe   :  { %p29_p5 = scmp.ne.s32.totalorder %s67_s1, %s28_s13  ;;  %p32_p6 = scmp.lt.u32.totalorder %s28_s13, %s67_s1 }
  0x10   :  { %p34_p7 = pnand %p32_p6, %p29_p5 }
  0x12   :  { %37 = shalt.err (!%p34_p7)
}
  0x13   :  { %12 = dma.vmem_to_hbm [thread:$0]  %s10_s8, 16, %s67_s1, [#allocation1]  }
  0x14   :  { %38 = dma.done.wait [#allocation1], 16  }
  0x15   :  { %39 = vsyncadd [#allocation1], 4294967280 }
  0x16   :  { %14 = vsyncpa [#allocation1], 1 }

// kernel: actnorm_forward.1
= control target key start
LH: loop header
LB: loop body
LE: loop exit
PB: predicated region body
PF: predicated region fallthrough
CT: control target
= control target key end

     0   :  { %s448_s12 = smov 0   ;;  %s450_s13 = smov 0   ;;  %s480_s0 = inlined_call_operand.vmem [shape: f32[8,256], index: 0, kind: input, shape index: {}]   ;;  %s481_s1 = inlined_call_operand.vmem [shape: f32[8,1], index: 1, kind: input, shape index: {}]   ;;  %s482_s2 = inlined_call_operand.vmem [shape: f32[8,1], index: 2, kind: input, shape index: {}]   ;;  %s483_s3 = inlined_call_operand.vmem [shape: f32[8,256], index: 3, kind: output, shape index: {}]  }
   0x1   :  { %s452_s14 = smov 0  }
   0x2 LB: > { %s22_s15 = sadd.s32 1, %s421_s13  ;;  %p372_p0 = scmp.ge.s32.totalorder %s425_s14, 1  ;;  %s425_s14 = sphi %s452_s14, %s13_s14   ;;  %s421_s13 = sphi %s450_s13, %s485_s13   ;;  %s417_s12 = sphi %s448_s12, %s484_s12  }
   0x3   : > { %p23_p1 = scmp.ge.s32.totalorder %s22_s15, 2  ;;  %p174_p2 = scmp.lt.s32.totalorder %s425_s14, 3 }
   0x5   : > { %s487_s15 = smov (%p23_p1, %s22_s15), 0  ;;  %p175_p3 = pnand %p372_p0, %p174_p2 }
   0x6   : > { %v238_v0 = vld [vmem:[%s481_s1] sm:$0xff] (!%p175_p3)  ;;  %v427_v1 = vmov (!%p175_p3), 0   ;;  %p214_p4 = scmp.lt.s32.totalorder (!%p175_p3), %s417_s12, 1 }
   0x7   : > { %178 = sbr.rel (%p175_p3) target bundleno = 143 (0x8f), region = 32  ;;  %402 = vset.pattern.permute.xlu0 (!%p175_p3), %v427_v1  ;;  %v237_v2 = vld [vmem:[%s482_s2] sm:$0xff] (!%p175_p3) }
   0x8   : > { %241 = vperm.xlu0 (!%p175_p3), %402, %v238_v0  }
   0xc   : > { %247 = vperm.xlu0 (!%p175_p3), %402, %v237_v2  }
   0xe   : > { %s489_s12 = smov (!%p214_p4, %s417_s12), 1 }
   0xf   : > { %s373_s20 = sshll.u32 %s489_s12, 3 }
  0x10   : > { %s219_s23 = scalar_lea.vmem %s480_s0, %s373_s20  ;;  %s235_s26 = scalar_lea.vmem %s483_s3, %s373_s20 }
  0x11   : > { %v236_v4 = vld [vmem:[%s219_s23] sm:$0xff] }
  0x87   : > { %v242_v3 = vpop.permute.xlu0 %241 }
  0x88   : > { %v244_v5 = vadd.f32 %v242_v3, %v236_v4 }
  0x8b   : > { %v248_v6 = vpop.permute.xlu0 %247 }
  0x8c   : > { %v250_v7 = vmul.f32 %v248_v6, %v244_v5 }
  0x8e   : > { %251 = vst [vmem:[%s235_s26] sm:$0xff] %v250_v7 }
  0x8f PF: > { %s13_s14 = sadd.s32 1, %s425_s14   ;;  %s484_s12 = smov %s421_s13 }
  0x90   : > { %p10_p5 = scmp.ge.s32.totalorder %s13_s14, 4   ;;  %s485_s13 = smov %s487_s15 }
  0x92   :  { %12 = sbr.rel (!%p10_p5) target bundleno = 2 (0x2), region = 68 }

</bundles_post_ra>
